<compile_context>
chip_gen: v7x
topology: tpu7x:2x2x1
jax: 0.10.0
libtpu: 0.0.40
codegen_flags: <defaults>
</compile_context>

<pallas_src>
import jax
import jax.numpy as jnp
from jax.experimental import pallas as pl
from jax.experimental.pallas import tpu as pltpu


# ---------------------------------------------------------------------------
# Kernels (feature-major: activations are [features, batch_tile])
# ---------------------------------------------------------------------------

def dqn_kernel_mxu(x_ref, w1_ref, b1_ref, w2_ref, b2_ref, w3_ref, b3_ref,
                   wo_ref, bo_ref, o_ref):
    """Throughput path: lane-dense MXU matmuls, relu(W @ h + b) per layer."""
    h = x_ref[...]                                               # [in, TB]
    h = jnp.maximum(
        jnp.dot(w1_ref[...], h, preferred_element_type=jnp.float32)
        + b1_ref[...], 0.0)                                      # [10, TB]
    h = jnp.maximum(
        jnp.dot(w2_ref[...], h, preferred_element_type=jnp.float32)
        + b2_ref[...], 0.0)                                      # [10, TB]
    h = jnp.maximum(
        jnp.dot(w3_ref[...], h, preferred_element_type=jnp.float32)
        + b3_ref[...], 0.0)                                      # [10, TB]
    o_ref[...] = (
        jnp.dot(wo_ref[...], h, preferred_element_type=jnp.float32)
        + bo_ref[...])                                           # [out, TB]


def dqn_kernel_vpu(x_ref, w1_ref, b1_ref, w2_ref, b2_ref, w3_ref, b3_ref,
                   wo_ref, bo_ref, o_ref):
    """Small-batch latency path: unrolled VPU broadcast-FMAs, no MXU round-trip.

    (Per review: the per-term single-lane broadcast here is acceptable -- this
    path is dispatch/latency-bound, not VPU-bound.)
    """
    def linear(w_ref, b_ref, h):
        w = w_ref[...]                                           # [out, K]
        b = b_ref[...]                                           # [out, 1]
        out_dim, k_dim = w.shape
        acc = jnp.broadcast_to(b, (out_dim, h.shape[1]))         # [out, B]
        for k in range(k_dim):                                   # K <= 10, unrolled
            acc = acc + w[:, k:k + 1] * h[k:k + 1, :]
        return acc

    h = x_ref[...]                                               # [in, B]
    h = jnp.maximum(linear(w1_ref, b1_ref, h), 0.0)
    h = jnp.maximum(linear(w2_ref, b2_ref, h), 0.0)
    h = jnp.maximum(linear(w3_ref, b3_ref, h), 0.0)
    o_ref[...] = linear(wo_ref, bo_ref, h)


# ---------------------------------------------------------------------------
# Wrappers
# ---------------------------------------------------------------------------

def _round_up(n, m):
    return ((n + m - 1) // m) * m


def dqn_forward_fm(x_fm, params, *, batch_block=65536, latency_batch=256):
    """Feature-major forward (preferred API, zero wrapper layout ops).

    x_fm:   [in_size, B] float32
    params: PyTorch-native [out, in] weights, [out, 1] biases
    returns [out_size, B] float32  (e.g. argmax over axis 0 for action select)
    """
    in_size, B = x_fm.shape
    out_size = params["wo"].shape[0]
    args = (params["w1"], params["b1"], params["w2"], params["b2"],
            params["w3"], params["b3"], params["wo"], params["bo"])

    vmem = pl.BlockSpec(memory_space=pltpu.MemorySpace.VMEM)
    cparams = pltpu.CompilerParams(vmem_limit_bytes=32 * 1024 * 1024)

    # Latency path: single ungridded block, VPU broadcast-FMAs (avoid MXU
    # push/pop latency for four chained 10-wide dots).
    if B <= latency_batch and in_size <= 32:
        return pl.pallas_call(
            dqn_kernel_vpu,
            out_shape=jax.ShapeDtypeStruct((out_size, B), jnp.float32),
            in_specs=[vmem] * 9,
            out_specs=vmem,
            compiler_params=cparams,
        )(x_fm, *args)

    # Throughput path, single ungridded block (grid-step overhead would
    # dominate at these sizes; whole-batch tiles are only ~KBs..MBs of VMEM).
    if B <= batch_block:
        return pl.pallas_call(
            dqn_kernel_mxu,
            out_shape=jax.ShapeDtypeStruct((out_size, B), jnp.float32),
            in_specs=[vmem] * 9,
            out_specs=vmem,
            compiler_params=cparams,
        )(x_fm, *args)

    # Very large batch: a few large tiles over a parallel 1-D grid (v7x
    # megacore shards the steps).  Partial final block, no pad, no slice.
    TB = _round_up(min(batch_block, B), 128)
    grid = (pl.cdiv(B, TB),)
    weight_specs = [pl.BlockSpec(a.shape, lambda i: (0, 0)) for a in args]

    return pl.pallas_call(
        dqn_kernel_mxu,
        out_shape=jax.ShapeDtypeStruct((out_size, B), jnp.float32),
        grid=grid,
        in_specs=[pl.BlockSpec((in_size, TB), lambda i: (0, i))] + weight_specs,
        out_specs=pl.BlockSpec((out_size, TB), lambda i: (0, i)),
        compiler_params=pltpu.CompilerParams(
            dimension_semantics=("parallel",),
            vmem_limit_bytes=32 * 1024 * 1024),
    )(x_fm, *args)


def dqn_forward(x, params, **kwargs):
    """PyTorch-layout adapter: [B, in] -> [B, out].

    Prefer `dqn_forward_fm` in the RL loop -- the two transposes here are
    separate HBM passes that XLA cannot fuse into the pallas_call.
    """
    return dqn_forward_fm(x.T, params, **kwargs).T


# ---------------------------------------------------------------------------
# Params / reference
# ---------------------------------------------------------------------------

def init_params(key, in_size, out_size):
    """PyTorch nn.Linear-style init: U[-1/sqrt(fan_in), +1/sqrt(fan_in)].
    Weights stored PyTorch-native [out, in]; biases as [out, 1] columns."""
    unit_sizes = [in_size, 10, 10, 10]
    dims = [(unit_sizes[0], unit_sizes[1]),
            (unit_sizes[1], unit_sizes[2]),
            (unit_sizes[2], unit_sizes[3]),
            (unit_sizes[3], out_size)]
    names = ["1", "2", "3", "o"]
    params = {}
    keys = jax.random.split(key, len(dims) * 2)
    for i, ((fan_in, fan_out), name) in enumerate(zip(dims, names)):
        bound = 1.0 / jnp.sqrt(jnp.float32(fan_in))
        w = jax.random.uniform(keys[2 * i], (fan_out, fan_in),
                               minval=-bound, maxval=bound, dtype=jnp.float32)
        b = jax.random.uniform(keys[2 * i + 1], (fan_out, 1),
                               minval=-bound, maxval=bound, dtype=jnp.float32)
        params[f"w{name}"] = w
        params[f"b{name}"] = b
    return params


def reference_forward(x, params):
    """Pure-JAX reference in the original PyTorch layout ([B, in] -> [B, out])."""
    h = x
    h = jnp.maximum(h @ params["w1"].T + params["b1"].T, 0.0)
    h = jnp.maximum(h @ params["w2"].T + params["b2"].T, 0.0)
    h = jnp.maximum(h @ params["w3"].T + params["b3"].T, 0.0)
    return h @ params["wo"].T + params["bo"].T


# ---------------------------------------------------------------------------
# Demo / self-test
# ---------------------------------------------------------------------------

if __name__ == "__main__":
    key = jax.random.PRNGKey(0)
    k_x1, k_x2, k_x3, k_p = jax.random.split(key, 4)

    in_size, out_size = 2, 4          # e.g. EazyMaze: (x, y) -> 4 actions
    params = init_params(k_p, in_size, out_size)
    TOL = dict(atol=1e-4, rtol=1e-4)

    # 1) Latency path (B <= 256): single VPU block, feature-major in/out.
    x_fm_small = jax.random.normal(k_x1, (in_size, 8), dtype=jnp.float32)
    out_fm_small = jax.block_until_ready(dqn_forward_fm(x_fm_small, params))
    ref_small = reference_forward(x_fm_small.T, params)      # harness-only transpose
    assert out_fm_small.shape == (out_size, 8)
    assert jnp.allclose(out_fm_small.T, ref_small, **TOL)

    # 2) Throughput path: single ungridded MXU block (default batch_block),
    #    jitted so params stay device-resident across calls (RL-loop pattern).
    x_fm_big = jax.random.normal(k_x2, (in_size, 512), dtype=jnp.float32)
    fwd = jax.jit(dqn_forward_fm)
    out_fm_big = jax.block_until_ready(fwd(x_fm_big, params))
    ref_big = reference_forward(x_fm_big.T, params)
    assert out_fm_big.shape == (out_size, 512)
    assert jnp.allclose(out_fm_big.T, ref_big, **TOL)

    # 3) Gridded path with a partial (clipped) final block -- no pad, no slice.
    #    B=513 with batch_block=256 -> grid of 3, last block has 1 valid column.
    x_fm_odd = jax.random.normal(k_x3, (in_size, 513), dtype=jnp.float32)
    out_fm_odd = jax.block_until_ready(
        dqn_forward_fm(x_fm_odd, params, batch_block=256))
    ref_odd = reference_forward(x_fm_odd.T, params)
    assert out_fm_odd.shape == (out_size, 513)
    assert jnp.allclose(out_fm_odd.T, ref_odd, **TOL)

    # 4) PyTorch-layout adapter parity ([B, in] -> [B, out]).
    out_bm = jax.block_until_ready(dqn_forward(x_fm_small.T, params))
    assert out_bm.shape == (8, out_size)
    assert jnp.allclose(out_bm, ref_small, **TOL)

    print("KERNEL_OK")
</pallas_src>

<mosaic_0001>
module attributes {stable_mosaic.version = 11 : i64} {
  func.func @dqn_kernel_vpu(%arg0: memref<2x8xf32, #tpu.memory_space<vmem>>, %arg1: memref<10x2xf32, #tpu.memory_space<vmem>>, %arg2: memref<10x1xf32, #tpu.memory_space<vmem>>, %arg3: memref<10x10xf32, #tpu.memory_space<vmem>>, %arg4: memref<10x1xf32, #tpu.memory_space<vmem>>, %arg5: memref<10x10xf32, #tpu.memory_space<vmem>>, %arg6: memref<10x1xf32, #tpu.memory_space<vmem>>, %arg7: memref<4x10xf32, #tpu.memory_space<vmem>>, %arg8: memref<4x1xf32, #tpu.memory_space<vmem>>, %arg9: memref<4x8xf32, #tpu.memory_space<vmem>>) attributes {dimension_semantics = [], scalar_prefetch = 0 : i64, scratch_operands = 0 : i64, tpu.core_type = #tpu.core_type<tc>} {
    %c0 = arith.constant 0 : index
    %c0_0 = arith.constant 0 : index
    %0 = vector.load %arg0[%c0, %c0_0] : memref<2x8xf32, #tpu.memory_space<vmem>>, vector<2x8xf32>
    %c0_1 = arith.constant 0 : index
    %c0_2 = arith.constant 0 : index
    %1 = vector.load %arg1[%c0_1, %c0_2] : memref<10x2xf32, #tpu.memory_space<vmem>>, vector<10x2xf32>
    %c0_3 = arith.constant 0 : index
    %c0_4 = arith.constant 0 : index
    %2 = vector.load %arg2[%c0_3, %c0_4] : memref<10x1xf32, #tpu.memory_space<vmem>>, vector<10x1xf32>
    %3 = vector.shape_cast %2 : vector<10x1xf32> to vector<10x1xf32>
    %4 = vector.broadcast %3 : vector<10x1xf32> to vector<10x8xf32>
    %5 = vector.extract_strided_slice %1 {offsets = [0, 0], sizes = [10, 1], strides = [1, 1]} : vector<10x2xf32> to vector<10x1xf32>
    %6 = vector.extract_strided_slice %0 {offsets = [0, 0], sizes = [1, 8], strides = [1, 1]} : vector<2x8xf32> to vector<1x8xf32>
    %7 = vector.broadcast %5 : vector<10x1xf32> to vector<10x8xf32>
    %8 = vector.broadcast %6 : vector<1x8xf32> to vector<10x8xf32>
    %9 = arith.mulf %7, %8 : vector<10x8xf32>
    %10 = arith.addf %4, %9 : vector<10x8xf32>
    %11 = vector.extract_strided_slice %1 {offsets = [0, 1], sizes = [10, 1], strides = [1, 1]} : vector<10x2xf32> to vector<10x1xf32>
    %12 = vector.extract_strided_slice %0 {offsets = [1, 0], sizes = [1, 8], strides = [1, 1]} : vector<2x8xf32> to vector<1x8xf32>
    %13 = vector.broadcast %11 : vector<10x1xf32> to vector<10x8xf32>
    %14 = vector.broadcast %12 : vector<1x8xf32> to vector<10x8xf32>
    %15 = arith.mulf %13, %14 : vector<10x8xf32>
    %16 = arith.addf %10, %15 : vector<10x8xf32>
    %cst = arith.constant 0.000000e+00 : f32
    %17 = vector.broadcast %cst : f32 to vector<10x8xf32>
    %18 = arith.maximumf %16, %17 : vector<10x8xf32>
    %c0_5 = arith.constant 0 : index
    %c0_6 = arith.constant 0 : index
    %19 = vector.load %arg3[%c0_5, %c0_6] : memref<10x10xf32, #tpu.memory_space<vmem>>, vector<10x10xf32>
    %c0_7 = arith.constant 0 : index
    %c0_8 = arith.constant 0 : index
    %20 = vector.load %arg4[%c0_7, %c0_8] : memref<10x1xf32, #tpu.memory_space<vmem>>, vector<10x1xf32>
    %21 = vector.shape_cast %20 : vector<10x1xf32> to vector<10x1xf32>
    %22 = vector.broadcast %21 : vector<10x1xf32> to vector<10x8xf32>
    %23 = vector.extract_strided_slice %19 {offsets = [0, 0], sizes = [10, 1], strides = [1, 1]} : vector<10x10xf32> to vector<10x1xf32>
    %24 = vector.extract_strided_slice %18 {offsets = [0, 0], sizes = [1, 8], strides = [1, 1]} : vector<10x8xf32> to vector<1x8xf32>
    %25 = vector.broadcast %23 : vector<10x1xf32> to vector<10x8xf32>
    %26 = vector.broadcast %24 : vector<1x8xf32> to vector<10x8xf32>
    %27 = arith.mulf %25, %26 : vector<10x8xf32>
    %28 = arith.addf %22, %27 : vector<10x8xf32>
    %29 = vector.extract_strided_slice %19 {offsets = [0, 1], sizes = [10, 1], strides = [1, 1]} : vector<10x10xf32> to vector<10x1xf32>
    %30 = vector.extract_strided_slice %18 {offsets = [1, 0], sizes = [1, 8], strides = [1, 1]} : vector<10x8xf32> to vector<1x8xf32>
    %31 = vector.broadcast %29 : vector<10x1xf32> to vector<10x8xf32>
    %32 = vector.broadcast %30 : vector<1x8xf32> to vector<10x8xf32>
    %33 = arith.mulf %31, %32 : vector<10x8xf32>
    %34 = arith.addf %28, %33 : vector<10x8xf32>
    %35 = vector.extract_strided_slice %19 {offsets = [0, 2], sizes = [10, 1], strides = [1, 1]} : vector<10x10xf32> to vector<10x1xf32>
    %36 = vector.extract_strided_slice %18 {offsets = [2, 0], sizes = [1, 8], strides = [1, 1]} : vector<10x8xf32> to vector<1x8xf32>
    %37 = vector.broadcast %35 : vector<10x1xf32> to vector<10x8xf32>
    %38 = vector.broadcast %36 : vector<1x8xf32> to vector<10x8xf32>
    %39 = arith.mulf %37, %38 : vector<10x8xf32>
    %40 = arith.addf %34, %39 : vector<10x8xf32>
    %41 = vector.extract_strided_slice %19 {offsets = [0, 3], sizes = [10, 1], strides = [1, 1]} : vector<10x10xf32> to vector<10x1xf32>
    %42 = vector.extract_strided_slice %18 {offsets = [3, 0], sizes = [1, 8], strides = [1, 1]} : vector<10x8xf32> to vector<1x8xf32>
    %43 = vector.broadcast %41 : vector<10x1xf32> to vector<10x8xf32>
    %44 = vector.broadcast %42 : vector<1x8xf32> to vector<10x8xf32>
    %45 = arith.mulf %43, %44 : vector<10x8xf32>
    %46 = arith.addf %40, %45 : vector<10x8xf32>
    %47 = vector.extract_strided_slice %19 {offsets = [0, 4], sizes = [10, 1], strides = [1, 1]} : vector<10x10xf32> to vector<10x1xf32>
    %48 = vector.extract_strided_slice %18 {offsets = [4, 0], sizes = [1, 8], strides = [1, 1]} : vector<10x8xf32> to vector<1x8xf32>
    %49 = vector.broadcast %47 : vector<10x1xf32> to vector<10x8xf32>
    %50 = vector.broadcast %48 : vector<1x8xf32> to vector<10x8xf32>
    %51 = arith.mulf %49, %50 : vector<10x8xf32>
    %52 = arith.addf %46, %51 : vector<10x8xf32>
    %53 = vector.extract_strided_slice %19 {offsets = [0, 5], sizes = [10, 1], strides = [1, 1]} : vector<10x10xf32> to vector<10x1xf32>
    %54 = vector.extract_strided_slice %18 {offsets = [5, 0], sizes = [1, 8], strides = [1, 1]} : vector<10x8xf32> to vector<1x8xf32>
    %55 = vector.broadcast %53 : vector<10x1xf32> to vector<10x8xf32>
    %56 = vector.broadcast %54 : vector<1x8xf32> to vector<10x8xf32>
    %57 = arith.mulf %55, %56 : vector<10x8xf32>
    %58 = arith.addf %52, %57 : vector<10x8xf32>
    %59 = vector.extract_strided_slice %19 {offsets = [0, 6], sizes = [10, 1], strides = [1, 1]} : vector<10x10xf32> to vector<10x1xf32>
    %60 = vector.extract_strided_slice %18 {offsets = [6, 0], sizes = [1, 8], strides = [1, 1]} : vector<10x8xf32> to vector<1x8xf32>
    %61 = vector.broadcast %59 : vector<10x1xf32> to vector<10x8xf32>
    %62 = vector.broadcast %60 : vector<1x8xf32> to vector<10x8xf32>
    %63 = arith.mulf %61, %62 : vector<10x8xf32>
    %64 = arith.addf %58, %63 : vector<10x8xf32>
    %65 = vector.extract_strided_slice %19 {offsets = [0, 7], sizes = [10, 1], strides = [1, 1]} : vector<10x10xf32> to vector<10x1xf32>
    %66 = vector.extract_strided_slice %18 {offsets = [7, 0], sizes = [1, 8], strides = [1, 1]} : vector<10x8xf32> to vector<1x8xf32>
    %67 = vector.broadcast %65 : vector<10x1xf32> to vector<10x8xf32>
    %68 = vector.broadcast %66 : vector<1x8xf32> to vector<10x8xf32>
    %69 = arith.mulf %67, %68 : vector<10x8xf32>
    %70 = arith.addf %64, %69 : vector<10x8xf32>
    %71 = vector.extract_strided_slice %19 {offsets = [0, 8], sizes = [10, 1], strides = [1, 1]} : vector<10x10xf32> to vector<10x1xf32>
    %72 = vector.extract_strided_slice %18 {offsets = [8, 0], sizes = [1, 8], strides = [1, 1]} : vector<10x8xf32> to vector<1x8xf32>
    %73 = vector.broadcast %71 : vector<10x1xf32> to vector<10x8xf32>
    %74 = vector.broadcast %72 : vector<1x8xf32> to vector<10x8xf32>
    %75 = arith.mulf %73, %74 : vector<10x8xf32>
    %76 = arith.addf %70, %75 : vector<10x8xf32>
    %77 = vector.extract_strided_slice %19 {offsets = [0, 9], sizes = [10, 1], strides = [1, 1]} : vector<10x10xf32> to vector<10x1xf32>
    %78 = vector.extract_strided_slice %18 {offsets = [9, 0], sizes = [1, 8], strides = [1, 1]} : vector<10x8xf32> to vector<1x8xf32>
    %79 = vector.broadcast %77 : vector<10x1xf32> to vector<10x8xf32>
    %80 = vector.broadcast %78 : vector<1x8xf32> to vector<10x8xf32>
    %81 = arith.mulf %79, %80 : vector<10x8xf32>
    %82 = arith.addf %76, %81 : vector<10x8xf32>
    %cst_9 = arith.constant 0.000000e+00 : f32
    %83 = vector.broadcast %cst_9 : f32 to vector<10x8xf32>
    %84 = arith.maximumf %82, %83 : vector<10x8xf32>
    %c0_10 = arith.constant 0 : index
    %c0_11 = arith.constant 0 : index
    %85 = vector.load %arg5[%c0_10, %c0_11] : memref<10x10xf32, #tpu.memory_space<vmem>>, vector<10x10xf32>
    %c0_12 = arith.constant 0 : index
    %c0_13 = arith.constant 0 : index
    %86 = vector.load %arg6[%c0_12, %c0_13] : memref<10x1xf32, #tpu.memory_space<vmem>>, vector<10x1xf32>
    %87 = vector.shape_cast %86 : vector<10x1xf32> to vector<10x1xf32>
    %88 = vector.broadcast %87 : vector<10x1xf32> to vector<10x8xf32>
    %89 = vector.extract_strided_slice %85 {offsets = [0, 0], sizes = [10, 1], strides = [1, 1]} : vector<10x10xf32> to vector<10x1xf32>
    %90 = vector.extract_strided_slice %84 {offsets = [0, 0], sizes = [1, 8], strides = [1, 1]} : vector<10x8xf32> to vector<1x8xf32>
    %91 = vector.broadcast %89 : vector<10x1xf32> to vector<10x8xf32>
    %92 = vector.broadcast %90 : vector<1x8xf32> to vector<10x8xf32>
    %93 = arith.mulf %91, %92 : vector<10x8xf32>
    %94 = arith.addf %88, %93 : vector<10x8xf32>
    %95 = vector.extract_strided_slice %85 {offsets = [0, 1], sizes = [10, 1], strides = [1, 1]} : vector<10x10xf32> to vector<10x1xf32>
    %96 = vector.extract_strided_slice %84 {offsets = [1, 0], sizes = [1, 8], strides = [1, 1]} : vector<10x8xf32> to vector<1x8xf32>
    %97 = vector.broadcast %95 : vector<10x1xf32> to vector<10x8xf32>
    %98 = vector.broadcast %96 : vector<1x8xf32> to vector<10x8xf32>
    %99 = arith.mulf %97, %98 : vector<10x8xf32>
    %100 = arith.addf %94, %99 : vector<10x8xf32>
    %101 = vector.extract_strided_slice %85 {offsets = [0, 2], sizes = [10, 1], strides = [1, 1]} : vector<10x10xf32> to vector<10x1xf32>
    %102 = vector.extract_strided_slice %84 {offsets = [2, 0], sizes = [1, 8], strides = [1, 1]} : vector<10x8xf32> to vector<1x8xf32>
    %103 = vector.broadcast %101 : vector<10x1xf32> to vector<10x8xf32>
    %104 = vector.broadcast %102 : vector<1x8xf32> to vector<10x8xf32>
    %105 = arith.mulf %103, %104 : vector<10x8xf32>
    %106 = arith.addf %100, %105 : vector<10x8xf32>
    %107 = vector.extract_strided_slice %85 {offsets = [0, 3], sizes = [10, 1], strides = [1, 1]} : vector<10x10xf32> to vector<10x1xf32>
    %108 = vector.extract_strided_slice %84 {offsets = [3, 0], sizes = [1, 8], strides = [1, 1]} : vector<10x8xf32> to vector<1x8xf32>
    %109 = vector.broadcast %107 : vector<10x1xf32> to vector<10x8xf32>
    %110 = vector.broadcast %108 : vector<1x8xf32> to vector<10x8xf32>
    %111 = arith.mulf %109, %110 : vector<10x8xf32>
    %112 = arith.addf %106, %111 : vector<10x8xf32>
    %113 = vector.extract_strided_slice %85 {offsets = [0, 4], sizes = [10, 1], strides = [1, 1]} : vector<10x10xf32> to vector<10x1xf32>
    %114 = vector.extract_strided_slice %84 {offsets = [4, 0], sizes = [1, 8], strides = [1, 1]} : vector<10x8xf32> to vector<1x8xf32>
    %115 = vector.broadcast %113 : vector<10x1xf32> to vector<10x8xf32>
    %116 = vector.broadcast %114 : vector<1x8xf32> to vector<10x8xf32>
    %117 = arith.mulf %115, %116 : vector<10x8xf32>
    %118 = arith.addf %112, %117 : vector<10x8xf32>
    %119 = vector.extract_strided_slice %85 {offsets = [0, 5], sizes = [10, 1], strides = [1, 1]} : vector<10x10xf32> to vector<10x1xf32>
    %120 = vector.extract_strided_slice %84 {offsets = [5, 0], sizes = [1, 8], strides = [1, 1]} : vector<10x8xf32> to vector<1x8xf32>
    %121 = vector.broadcast %119 : vector<10x1xf32> to vector<10x8xf32>
    %122 = vector.broadcast %120 : vector<1x8xf32> to vector<10x8xf32>
    %123 = arith.mulf %121, %122 : vector<10x8xf32>
    %124 = arith.addf %118, %123 : vector<10x8xf32>
    %125 = vector.extract_strided_slice %85 {offsets = [0, 6], sizes = [10, 1], strides = [1, 1]} : vector<10x10xf32> to vector<10x1xf32>
    %126 = vector.extract_strided_slice %84 {offsets = [6, 0], sizes = [1, 8], strides = [1, 1]} : vector<10x8xf32> to vector<1x8xf32>
    %127 = vector.broadcast %125 : vector<10x1xf32> to vector<10x8xf32>
    %128 = vector.broadcast %126 : vector<1x8xf32> to vector<10x8xf32>
    %129 = arith.mulf %127, %128 : vector<10x8xf32>
    %130 = arith.addf %124, %129 : vector<10x8xf32>
    %131 = vector.extract_strided_slice %85 {offsets = [0, 7], sizes = [10, 1], strides = [1, 1]} : vector<10x10xf32> to vector<10x1xf32>
    %132 = vector.extract_strided_slice %84 {offsets = [7, 0], sizes = [1, 8], strides = [1, 1]} : vector<10x8xf32> to vector<1x8xf32>
    %133 = vector.broadcast %131 : vector<10x1xf32> to vector<10x8xf32>
    %134 = vector.broadcast %132 : vector<1x8xf32> to vector<10x8xf32>
    %135 = arith.mulf %133, %134 : vector<10x8xf32>
    %136 = arith.addf %130, %135 : vector<10x8xf32>
    %137 = vector.extract_strided_slice %85 {offsets = [0, 8], sizes = [10, 1], strides = [1, 1]} : vector<10x10xf32> to vector<10x1xf32>
    %138 = vector.extract_strided_slice %84 {offsets = [8, 0], sizes = [1, 8], strides = [1, 1]} : vector<10x8xf32> to vector<1x8xf32>
    %139 = vector.broadcast %137 : vector<10x1xf32> to vector<10x8xf32>
    %140 = vector.broadcast %138 : vector<1x8xf32> to vector<10x8xf32>
    %141 = arith.mulf %139, %140 : vector<10x8xf32>
    %142 = arith.addf %136, %141 : vector<10x8xf32>
    %143 = vector.extract_strided_slice %85 {offsets = [0, 9], sizes = [10, 1], strides = [1, 1]} : vector<10x10xf32> to vector<10x1xf32>
    %144 = vector.extract_strided_slice %84 {offsets = [9, 0], sizes = [1, 8], strides = [1, 1]} : vector<10x8xf32> to vector<1x8xf32>
    %145 = vector.broadcast %143 : vector<10x1xf32> to vector<10x8xf32>
    %146 = vector.broadcast %144 : vector<1x8xf32> to vector<10x8xf32>
    %147 = arith.mulf %145, %146 : vector<10x8xf32>
    %148 = arith.addf %142, %147 : vector<10x8xf32>
    %cst_14 = arith.constant 0.000000e+00 : f32
    %149 = vector.broadcast %cst_14 : f32 to vector<10x8xf32>
    %150 = arith.maximumf %148, %149 : vector<10x8xf32>
    %c0_15 = arith.constant 0 : index
    %c0_16 = arith.constant 0 : index
    %151 = vector.load %arg7[%c0_15, %c0_16] : memref<4x10xf32, #tpu.memory_space<vmem>>, vector<4x10xf32>
    %c0_17 = arith.constant 0 : index
    %c0_18 = arith.constant 0 : index
    %152 = vector.load %arg8[%c0_17, %c0_18] : memref<4x1xf32, #tpu.memory_space<vmem>>, vector<4x1xf32>
    %153 = vector.shape_cast %152 : vector<4x1xf32> to vector<4x1xf32>
    %154 = vector.broadcast %153 : vector<4x1xf32> to vector<4x8xf32>
    %155 = vector.extract_strided_slice %151 {offsets = [0, 0], sizes = [4, 1], strides = [1, 1]} : vector<4x10xf32> to vector<4x1xf32>
    %156 = vector.extract_strided_slice %150 {offsets = [0, 0], sizes = [1, 8], strides = [1, 1]} : vector<10x8xf32> to vector<1x8xf32>
    %157 = vector.broadcast %155 : vector<4x1xf32> to vector<4x8xf32>
    %158 = vector.broadcast %156 : vector<1x8xf32> to vector<4x8xf32>
    %159 = arith.mulf %157, %158 : vector<4x8xf32>
    %160 = arith.addf %154, %159 : vector<4x8xf32>
    %161 = vector.extract_strided_slice %151 {offsets = [0, 1], sizes = [4, 1], strides = [1, 1]} : vector<4x10xf32> to vector<4x1xf32>
    %162 = vector.extract_strided_slice %150 {offsets = [1, 0], sizes = [1, 8], strides = [1, 1]} : vector<10x8xf32> to vector<1x8xf32>
    %163 = vector.broadcast %161 : vector<4x1xf32> to vector<4x8xf32>
    %164 = vector.broadcast %162 : vector<1x8xf32> to vector<4x8xf32>
    %165 = arith.mulf %163, %164 : vector<4x8xf32>
    %166 = arith.addf %160, %165 : vector<4x8xf32>
    %167 = vector.extract_strided_slice %151 {offsets = [0, 2], sizes = [4, 1], strides = [1, 1]} : vector<4x10xf32> to vector<4x1xf32>
    %168 = vector.extract_strided_slice %150 {offsets = [2, 0], sizes = [1, 8], strides = [1, 1]} : vector<10x8xf32> to vector<1x8xf32>
    %169 = vector.broadcast %167 : vector<4x1xf32> to vector<4x8xf32>
    %170 = vector.broadcast %168 : vector<1x8xf32> to vector<4x8xf32>
    %171 = arith.mulf %169, %170 : vector<4x8xf32>
    %172 = arith.addf %166, %171 : vector<4x8xf32>
    %173 = vector.extract_strided_slice %151 {offsets = [0, 3], sizes = [4, 1], strides = [1, 1]} : vector<4x10xf32> to vector<4x1xf32>
    %174 = vector.extract_strided_slice %150 {offsets = [3, 0], sizes = [1, 8], strides = [1, 1]} : vector<10x8xf32> to vector<1x8xf32>
    %175 = vector.broadcast %173 : vector<4x1xf32> to vector<4x8xf32>
    %176 = vector.broadcast %174 : vector<1x8xf32> to vector<4x8xf32>
    %177 = arith.mulf %175, %176 : vector<4x8xf32>
    %178 = arith.addf %172, %177 : vector<4x8xf32>
    %179 = vector.extract_strided_slice %151 {offsets = [0, 4], sizes = [4, 1], strides = [1, 1]} : vector<4x10xf32> to vector<4x1xf32>
    %180 = vector.extract_strided_slice %150 {offsets = [4, 0], sizes = [1, 8], strides = [1, 1]} : vector<10x8xf32> to vector<1x8xf32>
    %181 = vector.broadcast %179 : vector<4x1xf32> to vector<4x8xf32>
    %182 = vector.broadcast %180 : vector<1x8xf32> to vector<4x8xf32>
    %183 = arith.mulf %181, %182 : vector<4x8xf32>
    %184 = arith.addf %178, %183 : vector<4x8xf32>
    %185 = vector.extract_strided_slice %151 {offsets = [0, 5], sizes = [4, 1], strides = [1, 1]} : vector<4x10xf32> to vector<4x1xf32>
    %186 = vector.extract_strided_slice %150 {offsets = [5, 0], sizes = [1, 8], strides = [1, 1]} : vector<10x8xf32> to vector<1x8xf32>
    %187 = vector.broadcast %185 : vector<4x1xf32> to vector<4x8xf32>
    %188 = vector.broadcast %186 : vector<1x8xf32> to vector<4x8xf32>
    %189 = arith.mulf %187, %188 : vector<4x8xf32>
    %190 = arith.addf %184, %189 : vector<4x8xf32>
    %191 = vector.extract_strided_slice %151 {offsets = [0, 6], sizes = [4, 1], strides = [1, 1]} : vector<4x10xf32> to vector<4x1xf32>
    %192 = vector.extract_strided_slice %150 {offsets = [6, 0], sizes = [1, 8], strides = [1, 1]} : vector<10x8xf32> to vector<1x8xf32>
    %193 = vector.broadcast %191 : vector<4x1xf32> to vector<4x8xf32>
    %194 = vector.broadcast %192 : vector<1x8xf32> to vector<4x8xf32>
    %195 = arith.mulf %193, %194 : vector<4x8xf32>
    %196 = arith.addf %190, %195 : vector<4x8xf32>
    %197 = vector.extract_strided_slice %151 {offsets = [0, 7], sizes = [4, 1], strides = [1, 1]} : vector<4x10xf32> to vector<4x1xf32>
    %198 = vector.extract_strided_slice %150 {offsets = [7, 0], sizes = [1, 8], strides = [1, 1]} : vector<10x8xf32> to vector<1x8xf32>
    %199 = vector.broadcast %197 : vector<4x1xf32> to vector<4x8xf32>
    %200 = vector.broadcast %198 : vector<1x8xf32> to vector<4x8xf32>
    %201 = arith.mulf %199, %200 : vector<4x8xf32>
    %202 = arith.addf %196, %201 : vector<4x8xf32>
    %203 = vector.extract_strided_slice %151 {offsets = [0, 8], sizes = [4, 1], strides = [1, 1]} : vector<4x10xf32> to vector<4x1xf32>
    %204 = vector.extract_strided_slice %150 {offsets = [8, 0], sizes = [1, 8], strides = [1, 1]} : vector<10x8xf32> to vector<1x8xf32>
    %205 = vector.broadcast %203 : vector<4x1xf32> to vector<4x8xf32>
    %206 = vector.broadcast %204 : vector<1x8xf32> to vector<4x8xf32>
    %207 = arith.mulf %205, %206 : vector<4x8xf32>
    %208 = arith.addf %202, %207 : vector<4x8xf32>
    %209 = vector.extract_strided_slice %151 {offsets = [0, 9], sizes = [4, 1], strides = [1, 1]} : vector<4x10xf32> to vector<4x1xf32>
    %210 = vector.extract_strided_slice %150 {offsets = [9, 0], sizes = [1, 8], strides = [1, 1]} : vector<10x8xf32> to vector<1x8xf32>
    %211 = vector.broadcast %209 : vector<4x1xf32> to vector<4x8xf32>
    %212 = vector.broadcast %210 : vector<1x8xf32> to vector<4x8xf32>
    %213 = arith.mulf %211, %212 : vector<4x8xf32>
    %214 = arith.addf %208, %213 : vector<4x8xf32>
    %c0_19 = arith.constant 0 : index
    %c0_20 = arith.constant 0 : index
    %215 = vector.load %arg9[%c0_19, %c0_20] : memref<4x8xf32, #tpu.memory_space<vmem>>, vector<4x8xf32>
    tpu.vector_store %arg9[%c0_19, %c0_20], %214 {strides = array<i32>} : memref<4x8xf32, #tpu.memory_space<vmem>>, vector<4x8xf32>,
    return
  }
}

</mosaic_0001>

<bundles_post_ra>
// kernel: tpu_custom_call.1
= control target key start
LH: loop header
LB: loop body
LE: loop exit
PB: predicated region body
PF: predicated region fallthrough
CT: control target
= control target key end

     0   :  { %v643_v2 = vmov 0   ;;  %s898_s0 = inlined_call_operand.vmem [shape: f32[2,8], index: 0, kind: input, shape index: {}]   ;;  %s899_s1 = inlined_call_operand.vmem [shape: f32[10,2], index: 1, kind: input, shape index: {}]   ;;  %s900_s2 = inlined_call_operand.vmem [shape: f32[10,1], index: 2, kind: input, shape index: {}]   ;;  %s901_s3 = inlined_call_operand.vmem [shape: f32[10,10], index: 3, kind: input, shape index: {}]   ;;  %s902_s4 = inlined_call_operand.vmem [shape: f32[10,1], index: 4, kind: input, shape index: {}]   ;;  %s903_s5 = inlined_call_operand.vmem [shape: f32[10,10], index: 5, kind: input, shape index: {}]   ;;  %s904_s6 = inlined_call_operand.vmem [shape: f32[10,1], index: 6, kind: input, shape index: {}]   ;;  %s905_s7 = inlined_call_operand.vmem [shape: f32[4,10], index: 7, kind: input, shape index: {}]   ;;  %s906_s8 = inlined_call_operand.vmem [shape: f32[4,1], index: 8, kind: input, shape index: {}]   ;;  %s907_s9 = inlined_call_operand.hbm [shape: f32[4,8], index: 9, kind: output, shape index: {}]  }
   0x1   :  { %v36_v0 = vld [vmem:[%s900_s2] sm:$0xff]  ;;  %576 = vset.pattern.permute.xlu1 %v643_v2  ;;  %575 = vset.pattern.permute.xlu0 %v643_v2  ;;  %v37_v3 = vld [vmem:[%s900_s2 + $0x8] sm:$0x3] }
   0x2   :  { %v34_v1 = vld [vmem:[%s899_s1] sm:$0xff]  ;;  %40 = vperm.xlu0 %575, %v36_v0   ;;  %v35_v4 = vld [vmem:[%s899_s1 + $0x8] sm:$0x3] }
   0x3   :  { %50 = vperm.xlu1 %576, %v34_v1  }
   0x6   :  { %45 = vperm.xlu0 %575, %v37_v3  }
   0x7   :  { %55 = vperm.xlu1 %576, %v35_v4  }
   0x8   :  { %14 = vsyncpa [#allocation3], 0  ;;  %v87_v5 = vld [vmem:[%s902_s4 + $0x8] sm:$0x3]  ;;  %v644_v6 = vmov 1   ;;  %v86_v8 = vld [vmem:[%s902_s4] sm:$0xff]  ;;  %v58_v24 = vlaneseq }
   0x9   :  { %v85_v7 = vld [vmem:[%s901_s3 + $0x8] sm:$0x3]  ;;  %v645_v9 = vmov 2   ;;  %v84_v10 = vld [vmem:[%s901_s3] sm:$0xff]  ;;  %v646_v11 = vmov 8   ;;  %v647_v13 = vmov 4  }
   0xa   :  { %95 = vperm.xlu0 %575, %v87_v5   ;;  %v739_v12 = vld [vmem:[%s903_s5 + $0x8] sm:$0x3]  ;;  %v648_v14 = vmov 3   ;;  %v262_v15 = vld [vmem:[%s903_s5] sm:$0xff]  ;;  %v649_v16 = vmov 7   ;;  %v650_v17 = vmov 5  }
   0xb   :  { %577 = vset.pattern.permute.xlu1 %v644_v6  ;;  %v651_v18 = vmov 6   ;;  %v264_v19 = vld [vmem:[%s904_s6] sm:$0xff]  ;;  %v652_v21 = vmov 9   ;;  %v265_v23 = vld [vmem:[%s904_s6 + $0x8] sm:$0x3]  ;;  %v786_v25 = vshrl.u32 %v58_v24, 7 }
   0xc   :  { %71 = vperm.xlu1 %577, %v35_v4   ;;  %v441_v20 = vld [vmem:[%s906_s8] sm:$0xf]  ;;  %vm548_vm0 = vcmask 60416  }
   0xd   :  { %v769_v22 = vld [vmem:[%s905_s7] sm:$0xf]  ;;  %v790_v26 = vsub.s32 0, %v786_v25  ;;  %v797_v30 = vsub.s32 1, %v786_v25  ;;  %v816_v54 = vsub.s32 2, %v786_v25  ;;  %v825_v58 = vsub.s32 3, %v786_v25 }
   0xe   :  { %581 = vset.pattern.permute.xlu0 %v645_v9  ;;  %v33_v29 = vld [vmem:[%s898_s0] sm:$0x3]  ;;  %v829_v3 = vsub.s32 4, %v786_v25  ;;  %s653_s0 = smov [#allocation2]  }
   0xf   :  { %137 = vperm.xlu0 %581, %v85_v7   ;;  %v61_v31 = vrot.slane %v33_v29, %v790_v26  ;;  %v77_v35 = vrot.slane %v33_v29, %v797_v30  ;;  %s556_s10 = sshll.u32 %s653_s0, 4  ;;  %s557_s10 = int_to_ptr.vmem [resolvable:$true] %s556_s10 }
  0x10   :  { %578 = vset.pattern.permute.xlu1 %v643_v2  ;;  %s619_s11 = scalar_lea.vmem %s557_s10, 64  ;;  %p624_p1 = scmp.lt.s32.totalorder %s557_s10, %s557_s10 }
  0x11   :  { %90 = vperm.xlu1 %578, %v86_v8   ;;  %p620_p0 = scmp.ne.s32.totalorder %s557_s10, %s619_s11  ;;  %p625_p2 = scmp.lt.s32.totalorder %s619_s11, %s619_s11 }
  0x13   :  { %588 = vset.pattern.permute.xlu0 %v646_v11  ;;  %p626_p3 = por %p625_p2, %p624_p1 }
  0x14   :  { %233 = vperm.xlu0 %588, %v85_v7  }
  0x15   :  { %100 = vperm.xlu1 %578, %v84_v10   ;;  %p627_p4 = pnand %p626_p3, %p620_p0 }
  0x18   :  { %589 = vset.pattern.permute.xlu0 %v644_v6 }
  0x19   :  { %105 = vperm.xlu1 %578, %v85_v7   ;;  %67 = vperm.xlu0 %589, %v34_v1  }
  0x1d   :  { %579 = vset.pattern.permute.xlu1 %v644_v6  ;;  %117 = vperm.xlu0 %589, %v84_v10  }
  0x1e   :  { %121 = vperm.xlu1 %579, %v85_v7  }
  0x21   :  { %299 = vperm.xlu0 %589, %v739_v12  }
  0x22   :  { %580 = vset.pattern.permute.xlu1 %v645_v9 }
  0x23   :  { %133 = vperm.xlu1 %580, %v84_v10  }
  0x25   :  { %593 = vset.pattern.permute.xlu0 %v647_v13 }
  0x26   :  { %165 = vperm.xlu0 %593, %v84_v10  }
  0x27   :  { %582 = vset.pattern.permute.xlu1 %v648_v14 }
  0x28   :  { %149 = vperm.xlu1 %582, %v84_v10  }
  0x2a   :  { %343 = vperm.xlu0 %593, %v262_v15  }
  0x2c   :  { %153 = vperm.xlu1 %582, %v85_v7  }
  0x2e   :  { %596 = vset.pattern.permute.xlu0 %v649_v16 }
  0x2f   :  { %213 = vperm.xlu0 %596, %v84_v10  }
  0x30   :  { %583 = vset.pattern.permute.xlu1 %v647_v13 }
  0x31   :  { %169 = vperm.xlu1 %583, %v85_v7  }
  0x33   :  { %391 = vperm.xlu0 %596, %v262_v15  }
  0x35   :  { %584 = vset.pattern.permute.xlu1 %v650_v17 }
  0x36   :  { %181 = vperm.xlu1 %584, %v84_v10  }
  0x37   :  { %599 = vset.pattern.permute.xlu0 %v650_v17 }
  0x38   :  { %185 = vperm.xlu0 %599, %v85_v7  }
  0x3a   :  { %585 = vset.pattern.permute.xlu1 %v651_v18 }
  0x3b   :  { %197 = vperm.xlu1 %585, %v84_v10  }
  0x3c   :  { %363 = vperm.xlu0 %599, %v739_v12  }
  0x3f   :  { %201 = vperm.xlu1 %585, %v85_v7  }
  0x40   :  { %604 = vset.pattern.permute.xlu0 %v643_v2 }
  0x41   :  { %268 = vperm.xlu0 %604, %v264_v19  }
  0x43   :  { %586 = vset.pattern.permute.xlu1 %v649_v16 }
  0x44   :  { %217 = vperm.xlu1 %586, %v85_v7  }
  0x45   :  { %283 = vperm.xlu0 %604, %v739_v12  }
  0x48   :  { %587 = vset.pattern.permute.xlu1 %v646_v11 }
  0x49   :  { %229 = vperm.xlu1 %587, %v84_v10   ;;  %444 = vperm.xlu0 %604, %v441_v20  }
  0x4d   :  { %590 = vset.pattern.permute.xlu1 %v652_v21  ;;  %607 = vset.pattern.permute.xlu0 %v645_v9 }
  0x4e   :  { %245 = vperm.xlu1 %590, %v84_v10   ;;  %315 = vperm.xlu0 %607, %v739_v12  }
  0x52   :  { %249 = vperm.xlu1 %590, %v85_v7   ;;  %469 = vperm.xlu0 %607, %v769_v22  }
  0x56   :  { %591 = vset.pattern.permute.xlu1 %v643_v2  ;;  %612 = vset.pattern.permute.xlu0 %v652_v21 }
  0x57   :  { %273 = vperm.xlu1 %591, %v265_v23   ;;  %427 = vperm.xlu0 %612, %v739_v12  }
  0x5b   :  { %278 = vperm.xlu1 %591, %v262_v15   ;;  %615 = vset.pattern.permute.xlu0 %v651_v18 }
  0x5c   :  { %509 = vperm.xlu0 %615, %v769_v22  }
  0x5f   :  { %592 = vset.pattern.permute.xlu1 %v644_v6 }
  0x60   :  { %295 = vperm.xlu1 %592, %v262_v15   ;;  %618 = vset.pattern.permute.xlu0 %v652_v21 }
  0x61   :  { %539 = vperm.xlu0 %618, %v769_v22  }
  0x64   :  { %594 = vset.pattern.permute.xlu1 %v645_v9 }
  0x65   :  { %311 = vperm.xlu1 %594, %v262_v15  }
  0x69   :  { %595 = vset.pattern.permute.xlu1 %v648_v14 }
  0x6a   :  { %327 = vperm.xlu1 %595, %v262_v15  }
  0x6e   :  { %597 = vset.pattern.permute.xlu1 %v650_v17 }
  0x6f   :  { %359 = vperm.xlu1 %597, %v262_v15  }
  0x73   :  { %598 = vset.pattern.permute.xlu1 %v651_v18 }
  0x74   :  { %375 = vperm.xlu1 %598, %v262_v15  }
  0x78   :  { %600 = vset.pattern.permute.xlu1 %v646_v11 }
  0x79   :  { %407 = vperm.xlu1 %600, %v262_v15  }
  0x7d   :  { %601 = vset.pattern.permute.xlu1 %v652_v21 }
  0x7e   :  { %423 = vperm.xlu1 %601, %v262_v15  }
  0x81   :  { %v41_v28 = vpop.permute.xlu0 %40 }
  0x82   :  { %602 = vset.pattern.permute.xlu1 %v648_v14  ;;  %v51_v27 = vpop.permute.xlu1 %50 }
  0x83   :  { %331 = vperm.xlu1 %602, %v739_v12   ;;  %v62_v45 = vmul.f32 %v61_v31, %v51_v27 }
  0x85   :  { %v46_v33 = vpop.permute.xlu0 %45  ;;  %v64_v48 = vadd.f32 %v62_v45, %v41_v28 }
  0x86   :  { %v56_v32 = vpop.permute.xlu1 %55 }
  0x87   :  { %603 = vset.pattern.permute.xlu1 %v647_v13  ;;  %v63_v34 = vmul.f32 %v61_v31, %v56_v32  ;;  %v842_v32 = vsub.s32 5, %v786_v25 }
  0x88   :  { %347 = vperm.xlu1 %603, %v739_v12  }
  0x89   :  { %v96_v36 = vpop.permute.xlu0 %95  ;;  %v65_v38 = vadd.f32 %v63_v34, %v46_v33 }
  0x8b   :  { %v72_v37 = vpop.permute.xlu1 %71 }
  0x8c   :  { %v79_v39 = vmul.f32 %v77_v35, %v72_v37  ;;  %605 = vset.pattern.permute.xlu1 %v643_v2  ;;  %v850_v37 = vsub.s32 6, %v786_v25 }
  0x8d   :  { %449 = vperm.xlu1 %605, %v769_v22  }
  0x8e   :  { %v805_v40 = vadd.f32 %v79_v39, %v65_v38  ;;  %v138_v41 = vpop.permute.xlu0 %137  ;;  %v853_v38 = vsub.s32 7, %v786_v25 }
  0x90   :  { %v91_v42 = vpop.permute.xlu1 %90 }
  0x91   :  { %606 = vset.pattern.permute.xlu1 %v651_v18 }
  0x92   :  { %379 = vperm.xlu1 %606, %v739_v12  }
  0x93   :  { %v809_v43 = vpop.permute.xlu0 %233 }
  0x94   :  { %v101_v44 = vpop.permute.xlu1 %100 }
  0x96   :  { %608 = vset.pattern.permute.xlu1 %v644_v6 }
  0x97   :  { %459 = vperm.xlu1 %608, %v769_v22  }
  0x98   :  { %v106_v46 = vpop.permute.xlu1 %105  ;;  %v68_v47 = vpop.permute.xlu0 %67 }
  0x99   :  { %v78_v49 = vmul.f32 %v77_v35, %v68_v47 }
  0x9b   :  { %609 = vset.pattern.permute.xlu1 %v649_v16  ;;  %v80_v50 = vadd.f32 %v78_v49, %v64_v48 }
  0x9c   :  { %395 = vperm.xlu1 %609, %v739_v12   ;;  %v118_v52 = vpop.permute.xlu0 %117 }
  0x9d   :  { %v122_v51 = vpop.permute.xlu1 %121  ;;  %v82_v53 = vmax.f32 %v80_v50, 0.0  ;;  %v83_v50 = vmax.f32 %v805_v40, 0.0 }
  0x9f   :  { %v111_v55 = vrot.slane %v82_v53, %v790_v26  ;;  %v127_v56 = vrot.slane %v82_v53, %v797_v30  ;;  %v143_v63 = vrot.slane %v82_v53, %v816_v54  ;;  %v159_v4 = vrot.slane %v82_v53, %v825_v58 }
  0xa0   :  { %610 = vset.pattern.permute.xlu1 %v646_v11  ;;  %v822_v57 = vpop.permute.xlu0 %299  ;;  %v175_v15 = vrot.slane %v82_v53, %v829_v3  ;;  %v191_v35 = vrot.slane %v82_v53, %v842_v32  ;;  %v223_v45 = vrot.slane %v82_v53, %v853_v38 }
  0xa1   :  { %411 = vperm.xlu1 %610, %v739_v12   ;;  %v113_v59 = vmul.f32 %v111_v55, %v106_v46  ;;  %v129_v60 = vmul.f32 %v127_v56, %v122_v51  ;;  %v112_v61 = vmul.f32 %v111_v55, %v101_v44  ;;  %v128_v2 = vmul.f32 %v127_v56, %v118_v52 }
  0xa2   :  { %v134_v62 = vpop.permute.xlu1 %133  ;;  %v145_v8 = vmul.f32 %v143_v63, %v138_v41  ;;  %v207_v44 = vrot.slane %v82_v53, %v850_v37  ;;  %v239_v56 = vrot.slane %v83_v50, %v790_v26 }
  0xa3   :  { %v115_v0 = vadd.f32 %v113_v59, %v96_v36  ;;  %v114_v1 = vadd.f32 %v112_v61, %v91_v42  ;;  %v144_v7 = vmul.f32 %v143_v63, %v134_v62 }
  0xa5   :  { %611 = vset.pattern.permute.xlu1 %v648_v14  ;;  %v131_v5 = vadd.f32 %v129_v60, %v115_v0  ;;  %v130_v6 = vadd.f32 %v128_v2, %v114_v1  ;;  %v166_v9 = vpop.permute.xlu0 %165  ;;  %v241_v60 = vmul.f32 %v239_v56, %v809_v43  ;;  %v255_v0 = vrot.slane %v83_v50, %v797_v30 }
  0xa6   :  { %479 = vperm.xlu1 %611, %v769_v22   ;;  %v176_v20 = vmul.f32 %v175_v15, %v166_v9 }
  0xa7   :  { %v150_v10 = vpop.permute.xlu1 %149  ;;  %v146_v12 = vadd.f32 %v144_v7, %v130_v6  ;;  %v147_v19 = vadd.f32 %v145_v8, %v131_v5 }
  0xa8   :  { %v160_v18 = vmul.f32 %v159_v4, %v150_v10 }
  0xa9   :  { %v836_v14 = vpop.permute.xlu0 %343 }
  0xaa   :  { %v162_v21 = vadd.f32 %v160_v18, %v146_v12  ;;  %613 = vset.pattern.permute.xlu1 %v647_v13 }
  0xab   :  { %489 = vperm.xlu1 %613, %v769_v22   ;;  %v154_v23 = vpop.permute.xlu1 %153 }
  0xac   :  { %v161_v24 = vmul.f32 %v159_v4, %v154_v23  ;;  %v178_v27 = vadd.f32 %v176_v20, %v162_v21 }
  0xae   :  { %v163_v28 = vadd.f32 %v161_v24, %v147_v19  ;;  %v214_v29 = vpop.permute.xlu0 %213 }
  0xaf   :  { %614 = vset.pattern.permute.xlu1 %v650_v17  ;;  %v224_v48 = vmul.f32 %v223_v45, %v214_v29 }
  0xb0   :  { %499 = vperm.xlu1 %614, %v769_v22   ;;  %v170_v31 = vpop.permute.xlu1 %169 }
  0xb1   :  { %v177_v33 = vmul.f32 %v175_v15, %v170_v31 }
  0xb2   :  { %v844_v13 = vpop.permute.xlu0 %391 }
  0xb3   :  { %v179_v34 = vadd.f32 %v177_v33, %v163_v28 }
  0xb4   :  { %616 = vset.pattern.permute.xlu1 %v649_v16 }
  0xb5   :  { %519 = vperm.xlu1 %616, %v769_v22   ;;  %v182_v36 = vpop.permute.xlu1 %181 }
  0xb6   :  { %v192_v17 = vmul.f32 %v191_v35, %v182_v36 }
  0xb7   :  { %v186_v41 = vpop.permute.xlu0 %185 }
  0xb8   :  { %v194_v39 = vadd.f32 %v192_v17, %v178_v27  ;;  %v193_v42 = vmul.f32 %v191_v35, %v186_v41 }
  0xb9   :  { %617 = vset.pattern.permute.xlu1 %v646_v11 }
  0xba   :  { %529 = vperm.xlu1 %617, %v769_v22   ;;  %v198_v16 = vpop.permute.xlu1 %197  ;;  %v195_v46 = vadd.f32 %v193_v42, %v179_v34 }
  0xbb   :  { %v208_v47 = vmul.f32 %v207_v44, %v198_v16  ;;  %v364_v10 = vpop.permute.xlu0 %363 }
  0xbd   :  { %v210_v49 = vadd.f32 %v208_v47, %v194_v39 }
  0xbe   :  { %v202_v25 = vpop.permute.xlu1 %201 }
  0xbf   :  { %v209_v51 = vmul.f32 %v207_v44, %v202_v25  ;;  %v226_v52 = vadd.f32 %v224_v48, %v210_v49 }
  0xc0   :  { %v269_v23 = vpop.permute.xlu0 %268 }
  0xc1   :  { %v211_v55 = vadd.f32 %v209_v51, %v195_v46 }
  0xc3   :  { %v218_v11 = vpop.permute.xlu1 %217 }
  0xc4   :  { %v225_v59 = vmul.f32 %v223_v45, %v218_v11 }
  0xc6   :  { %v227_v22 = vadd.f32 %v225_v59, %v211_v55 }
  0xc8   :  { %v230_v61 = vpop.permute.xlu1 %229  ;;  %v243_v62 = vadd.f32 %v241_v60, %v227_v22 }
  0xc9   :  { %v240_v53 = vmul.f32 %v239_v56, %v230_v61 }
  0xcb   :  { %v242_v63 = vadd.f32 %v240_v53, %v226_v52 }
  0xcd   :  { %v246_v1 = vpop.permute.xlu1 %245 }
  0xce   :  { %v256_v2 = vmul.f32 %v255_v0, %v246_v1 }
  0xd0   :  { %v258_v40 = vadd.f32 %v256_v2, %v242_v63 }
  0xd1   :  { %v250_v4 = vpop.permute.xlu1 %249 }
  0xd2   :  { %v257_v5 = vmul.f32 %v255_v0, %v250_v4  ;;  %v260_v9 = vmax.f32 %v258_v40, 0.0 }
  0xd4   :  { %v259_v6 = vadd.f32 %v257_v5, %v243_v62  ;;  %v289_v43 = vrot.slane %v260_v9, %v790_v26  ;;  %v305_v15 = vrot.slane %v260_v9, %v797_v30  ;;  %v321_v19 = vrot.slane %v260_v9, %v816_v54  ;;  %v284_v62 = vpop.permute.xlu0 %283 }
  0xd5   :  { %v337_v29 = vrot.slane %v260_v9, %v825_v58  ;;  %v353_v35 = vrot.slane %v260_v9, %v829_v3  ;;  %v369_v41 = vrot.slane %v260_v9, %v842_v32  ;;  %v385_v16 = vrot.slane %v260_v9, %v850_v37 }
  0xd6   :  { %v274_v7 = vpop.permute.xlu1 %273  ;;  %v401_v45 = vrot.slane %v260_v9, %v853_v38  ;;  %v261_v46 = vmax.f32 %v259_v6, 0.0  ;;  %v291_v63 = vmul.f32 %v289_v43, %v284_v62 }
  0xd7   :  { %v354_v39 = vmul.f32 %v353_v35, %v836_v14 }
  0xd8   :  { %v402_v25 = vmul.f32 %v401_v45, %v844_v13  ;;  %v417_v51 = vrot.slane %v261_v46, %v790_v26  ;;  %v433_v11 = vrot.slane %v261_v46, %v797_v30  ;;  %v445_v0 = vpop.permute.xlu0 %444  ;;  %v293_v2 = vadd.f32 %v291_v63, %v274_v7 }
  0xd9   :  { %v307_v13 = vmul.f32 %v305_v15, %v822_v57 }
  0xda   :  { %v279_v8 = vpop.permute.xlu1 %278 }
  0xdb   :  { %v290_v18 = vmul.f32 %v289_v43, %v279_v8  ;;  %v309_v40 = vadd.f32 %v307_v13, %v293_v2 }
  0xdc   :  { %v316_v5 = vpop.permute.xlu0 %315 }
  0xdd   :  { %v292_v24 = vadd.f32 %v290_v18, %v269_v23  ;;  %v323_v6 = vmul.f32 %v321_v19, %v316_v5 }
  0xdf   :  { %v296_v12 = vpop.permute.xlu1 %295  ;;  %v325_v9 = vadd.f32 %v323_v6, %v309_v40 }
  0xe0   :  { %v306_v20 = vmul.f32 %v305_v15, %v296_v12  ;;  %v470_v23 = vpop.permute.xlu0 %469 }
  0xe2   :  { %v308_v28 = vadd.f32 %v306_v20, %v292_v24  ;;  %v371_v24 = vmul.f32 %v369_v41, %v364_v10 }
  0xe4   :  { %v312_v21 = vpop.permute.xlu1 %311 }
  0xe5   :  { %v322_v27 = vmul.f32 %v321_v19, %v312_v21 }
  0xe7   :  { %v324_v33 = vadd.f32 %v322_v27, %v308_v28 }
  0xe9   :  { %v328_v31 = vpop.permute.xlu1 %327 }
  0xea   :  { %v338_v34 = vmul.f32 %v337_v29, %v328_v31 }
  0xec   :  { %v340_v36 = vadd.f32 %v338_v34, %v324_v33  ;;  %v428_v34 = vpop.permute.xlu0 %427 }
  0xee   :  { %v360_v17 = vpop.permute.xlu1 %359  ;;  %v356_v42 = vadd.f32 %v354_v39, %v340_v36 }
  0xef   :  { %v370_v44 = vmul.f32 %v369_v41, %v360_v17  ;;  %v435_v17 = vmul.f32 %v433_v11, %v428_v34 }
  0xf1   :  { %v372_v48 = vadd.f32 %v370_v44, %v356_v42 }
  0xf3   :  { %v376_v47 = vpop.permute.xlu1 %375 }
  0xf4   :  { %v386_v49 = vmul.f32 %v385_v16, %v376_v47 }
  0xf6   :  { %v388_v50 = vadd.f32 %v386_v49, %v372_v48 }
  0xf8   :  { %v408_v52 = vpop.permute.xlu1 %407  ;;  %v404_v55 = vadd.f32 %v402_v25, %v388_v50 }
  0xf9   :  { %v418_v14 = vmul.f32 %v417_v51, %v408_v52 }
  0xfb   :  { %v420_v56 = vadd.f32 %v418_v14, %v404_v55 }
  0xfd   :  { %v424_v59 = vpop.permute.xlu1 %423 }
  0xfe   :  { %v434_v60 = vmul.f32 %v433_v11, %v424_v59 }
 0x100   :  { %v436_v22 = vadd.f32 %v434_v60, %v420_v56  ;;  %v510_v60 = vpop.permute.xlu0 %509 }
 0x102   :  { %v332_v61 = vpop.permute.xlu1 %331  ;;  %v438_v43 = vmax.f32 %v436_v22, 0.0 }
 0x103   :  { %v339_v8 = vmul.f32 %v337_v29, %v332_v61 }
 0x104   :  { %v455_v57 = vrot.slane %v438_v43, %v790_v26  ;;  %v495_v50 = vrot.slane %v438_v43, %v829_v3  ;;  %v505_v55 = vrot.slane %v438_v43, %v842_v32  ;;  %v515_v56 = vrot.slane %v438_v43, %v850_v37 }
 0x105   :  { %v341_v20 = vadd.f32 %v339_v8, %v325_v9  ;;  %v525_v62 = vrot.slane %v438_v43, %v853_v38 }
 0x106   :  { %v516_v22 = vmul.f32 %v515_v56, %v510_v60 }
 0x107   :  { %v348_v53 = vpop.permute.xlu1 %347 }
 0x108   :  { %v355_v12 = vmul.f32 %v353_v35, %v348_v53  ;;  %v465_v35 = vrot.slane %v438_v43, %v797_v30 }
 0x10a   :  { %v357_v21 = vadd.f32 %v355_v12, %v341_v20 }
 0x10c   :  { %v450_v1 = vpop.permute.xlu1 %449  ;;  %v373_v31 = vadd.f32 %v371_v24, %v357_v21 }
 0x10d   :  { %v456_v29 = vmul.f32 %v455_v57, %v450_v1  ;;  %v540_v1 = vpop.permute.xlu0 %539 }
 0x10f   :  { %v457_v41 = vadd.f32 %v456_v29, %v445_v0 }
 0x111   :  { %v380_v4 = vpop.permute.xlu1 %379 }
 0x112   :  { %v387_v27 = vmul.f32 %v385_v16, %v380_v4  ;;  %v475_v16 = vrot.slane %v438_v43, %v816_v54 }
 0x114   :  { %v389_v7 = vadd.f32 %v387_v27, %v373_v31  ;;  %v476_v47 = vmul.f32 %v475_v16, %v470_v23 }
 0x116   :  { %v460_v18 = vpop.permute.xlu1 %459 }
 0x117   :  { %v466_v42 = vmul.f32 %v465_v35, %v460_v18 }
 0x119   :  { %v467_v46 = vadd.f32 %v466_v42, %v457_v41 }
 0x11b   :  { %v396_v28 = vpop.permute.xlu1 %395  ;;  %v477_v25 = vadd.f32 %v476_v47, %v467_v46 }
 0x11c   :  { %v403_v33 = vmul.f32 %v401_v45, %v396_v28  ;;  %v485_v45 = vrot.slane %v438_v43, %v825_v58 }
 0x11e   :  { %v405_v36 = vadd.f32 %v403_v33, %v389_v7 }
 0x120   :  { %v412_v15 = vpop.permute.xlu1 %411 }
 0x121   :  { %v419_v19 = vmul.f32 %v417_v51, %v412_v15 }
 0x123   :  { %v421_v39 = vadd.f32 %v419_v19, %v405_v36 }
 0x125   :  { %v437_v44 = vadd.f32 %v435_v17, %v421_v39  ;;  %v480_v10 = vpop.permute.xlu1 %479 }
 0x126   :  { %v486_v48 = vmul.f32 %v485_v45, %v480_v10 }
 0x127   :  { %v439_v61 = vmax.f32 %v437_v44, 0.0 }
 0x128   :  { %v487_v52 = vadd.f32 %v486_v48, %v477_v25 }
 0x129   :  { %v545_v3 = vrot.slane %v439_v61, %v797_v30  ;;  %v535_v0 = vrot.slane %v439_v61, %v790_v26 }
 0x12a   :  { %v490_v49 = vpop.permute.xlu1 %489 }
 0x12b   :  { %v496_v51 = vmul.f32 %v495_v50, %v490_v49  ;;  %v546_v37 = vmul.f32 %v545_v3, %v540_v1 }
 0x12d   :  { %v497_v11 = vadd.f32 %v496_v51, %v487_v52 }
 0x12f   :  { %v500_v14 = vpop.permute.xlu1 %499 }
 0x130   :  { %v506_v59 = vmul.f32 %v505_v55, %v500_v14 }
 0x132   :  { %v507_v54 = vadd.f32 %v506_v59, %v497_v11 }
 0x134   :  { %v520_v58 = vpop.permute.xlu1 %519  ;;  %v517_v53 = vadd.f32 %v516_v22, %v507_v54 }
 0x135   :  { %v526_v63 = vmul.f32 %v525_v62, %v520_v58 }
 0x137   :  { %v527_v2 = vadd.f32 %v526_v63, %v517_v53 }
 0x139   :  { %v530_v32 = vpop.permute.xlu1 %529 }
 0x13a   :  { %v536_v13 = vmul.f32 %v535_v0, %v530_v32 }
 0x13c   :  { %v537_v40 = vadd.f32 %v536_v13, %v527_v2 }
 0x13e   :  { %v547_v4 = vadd.f32 %v546_v37, %v537_v40 }
 0x140   :  { %549 = vst.msk [vmem:[#allocation2] sm:$0xf] %vm548_vm0, %v547_v4 }
 0x141   :  { %630 = shalt.err (!%p627_p4)
}
 0x142   :  { %s631_s14 = scalar_lea.hbm %s907_s9, 64 }
 0x143   :  { %p632_p5 = scmp.ne.s32.totalorder %s907_s9, %s631_s14  ;;  %p635_p6 = scmp.lt.u32.totalorder %s631_s14, %s907_s9 }
 0x145   :  { %p637_p7 = pnand %p635_p6, %p632_p5 }
 0x147   :  { %640 = shalt.err (!%p637_p7)
}
 0x148   :  { %559 = dma.vmem_to_hbm [thread:$0]  %s557_s10, 64, %s907_s9, [#allocation3]  }
 0x149   :  { %641 = dma.done.wait [#allocation3], 64  }
 0x14a   :  { %642 = vsyncadd [#allocation3], 4294967232 }
 0x14b   :  { %563 = vsyncpa [#allocation3], 1 }

</bundles_post_ra>
